<compile_context>
chip_gen: v7x
topology: tpu7x:2x2x1
jax: 0.10.0
libtpu: 0.0.40
codegen_flags: <defaults>
</compile_context>

<pallas_src>
import jax
import jax.numpy as jnp
from jax.experimental import pallas as pl
from jax.experimental.pallas import tpu as pltpu


_NEG_BIG = -1e30            # f32 bias for padded logit columns; exp() underflows to exactly 0
_DEFAULT_SCOPED = 12 << 20  # stay under the smallest scoped-VMEM default (v5e: 16 MiB)


def _round_up(a, m):
    return ((a + m - 1) // m) * m


def _vmem_capacity_bytes():
    # Generation-aware physical VMEM (v5e/v6e: 128 MiB, v7x: 64 MiB per TC).
    try:
        return int(pltpu.get_tpu_info().vmem_capacity_bytes)
    except Exception:
        return 64 << 20     # conservative fallback (v7x per-TensorCore)


def _vmem_estimate(tm, d_in, d_pad, x_bytes, w_bytes, out_bytes):
    # Count what the compiler actually holds per kernel instance:
    #  - double-buffered x and output tiles,
    #  - W / bias are grid-invariant but Pallas still allocates 2 buffers each,
    #  - f32 logits + exp intermediates of the softmax,
    #  - ~2 MiB Mosaic internal scratch headroom.
    return (2 * tm * d_in * x_bytes
            + 2 * tm * d_pad * out_bytes
            + 2 * d_in * d_pad * w_bytes
            + 2 * d_pad * 4
            + 2 * tm * d_pad * 4
            + (2 << 20))


def _gate_kernel(x_ref, w_ref, b_ref, o_ref):
    # MXU matmul in the native (bf16/f32) input dtype, f32 accumulation.
    logits = jnp.dot(x_ref[...], w_ref[...], preferred_element_type=jnp.float32)
    logits = logits + b_ref[...]                       # bias pre-cast to f32, shape (1, D_pad)
    # Numerically stable softmax over the last dim. Note: for small D_in the
    # EUP (exp over TM*D_pad elements) is the likely binding slot, not the MXU;
    # the subtract / multiply below are VPU filler under that slack.
    m = jnp.max(logits, axis=-1, keepdims=True)
    e = jnp.exp(logits - m)
    denom = jnp.sum(e, axis=-1, keepdims=True)
    # Exact divide: approx EUP reciprocal left rows ~1e-3 away from summing to 1,
    # too loose if a downstream router renormalizes top-k weights.
    o_ref[...] = (e / denom).astype(o_ref.dtype)


class GateFunction:
    """softmax(x @ W + b, axis=-1); W stored (D_in, D_out) (transposed vs torch)."""

    def __init__(self, weight, bias, *, block_rows=512, prefer_bf16_inputs=True):
        assert weight.ndim == 2 and bias.shape == (weight.shape[1],)
        self.d_in, self.d_out = int(weight.shape[0]), int(weight.shape[1])
        self.block_rows = int(block_rows)
        self.prefer_bf16 = bool(prefer_bf16_inputs)

        # Lane-dense output: pad D_out up to a multiple of 128 lanes so the
        # output store is an unmasked vst. Done ONCE here, not per call.
        self.d_pad = _round_up(self.d_out, 128)

        w = weight
        if self.prefer_bf16 and w.dtype == jnp.float32:
            # f32 matmul is a multi-pass bf16 decomposition on the MXU (~3x) and
            # doubles HBM bytes; gating logits tolerate bf16 inputs.
            w = w.astype(jnp.bfloat16)
        if self.d_pad != self.d_out:
            w = jnp.pad(w, ((0, 0), (0, self.d_pad - self.d_out)))
            b = jnp.pad(bias.astype(jnp.float32), (0, self.d_pad - self.d_out),
                        constant_values=_NEG_BIG)
        else:
            b = bias.astype(jnp.float32)
        self.w = w                               # (D_in, D_pad), resident across the grid
        self.b2 = b.reshape(1, self.d_pad)       # (1, D_pad), f32

    def __call__(self, x):
        assert x.ndim == 2 and x.shape[1] == self.d_in
        B = int(x.shape[0])
        out_dtype = x.dtype                      # output keeps the caller's dtype

        if self.prefer_bf16 and x.dtype == jnp.float32:
            x = x.astype(jnp.bfloat16)

        x_bytes = jnp.dtype(x.dtype).itemsize
        w_bytes = jnp.dtype(self.w.dtype).itemsize
        out_bytes = jnp.dtype(out_dtype).itemsize

        phys = _vmem_capacity_bytes()
        cap = (48 << 20) if phys <= (64 << 20) else (100 << 20)

        # Batch tile: multiple of 8 sublanes; >= 2 grid steps when B allows, so
        # both v7x TensorCores get work and the prologue x DMA is overlapped.
        tm = max(8, min(self.block_rows, _round_up(pl.cdiv(B, 2), 8)))
        # If the tile set would not fit the per-generation scoped budget,
        # shrink TM (no silent clamping of the limit).
        while tm > 8 and _vmem_estimate(tm, self.d_in, self.d_pad,
                                        x_bytes, w_bytes, out_bytes) > cap:
            tm = max(8, _round_up(tm // 2, 8))
        est = _vmem_estimate(tm, self.d_in, self.d_pad, x_bytes, w_bytes, out_bytes)

        vmem_limit = None
        if est > _DEFAULT_SCOPED:
            vmem_limit = min(est, cap)

        # No batch padding copy: Pallas masks the partial last block; garbage
        # rows only affect their own (discarded) output rows.
        grid = (pl.cdiv(B, tm),)

        out_padded = pl.pallas_call(
            _gate_kernel,
            out_shape=jax.ShapeDtypeStruct((B, self.d_pad), out_dtype),
            grid_spec=pltpu.PrefetchScalarGridSpec(
                num_scalar_prefetch=0,
                grid=grid,
                in_specs=[
                    pl.BlockSpec((tm, self.d_in), lambda i: (i, 0)),           # x: streamed
                    pl.BlockSpec((self.d_in, self.d_pad), lambda i: (0, 0)),   # W: resident
                    pl.BlockSpec((1, self.d_pad), lambda i: (0, 0)),           # bias: resident
                ],
                out_specs=pl.BlockSpec((tm, self.d_pad), lambda i: (i, 0)),
            ),
            compiler_params=pltpu.CompilerParams(
                dimension_semantics=("parallel",),   # shard batch over v7x's 2 TCs
                vmem_limit_bytes=vmem_limit,
            ),
        )(x, self.w, self.b2)

        # Slice away lane padding (padded columns are exact zeros). If the
        # consumer accepts the (B, D_pad) layout, this slice can be dropped.
        return out_padded[:, :self.d_out]


if __name__ == "__main__":
    key = jax.random.PRNGKey(0)
    k_x, k_w, k_b = jax.random.split(key, 3)

    batch, input_size, output_size = 8, 32, 16

    # Deterministic PyTorch-Linear-style init: U(-1/sqrt(in), 1/sqrt(in))
    bound = 1.0 / (input_size ** 0.5)
    w = jax.random.uniform(k_w, (input_size, output_size), jnp.float32,
                           minval=-bound, maxval=bound)
    b = jax.random.uniform(k_b, (output_size,), jnp.float32,
                           minval=-bound, maxval=bound)
    x = jax.random.normal(k_x, (batch, input_size), jnp.float32)

    gate = GateFunction(w, b)                    # default: bf16 inputs, f32 math/output
    out = jax.block_until_ready(gate(x))

    # Reference uses the same bf16 input rounding (kernel accumulates in f32,
    # so both sides do exact f32 arithmetic on bf16-rounded inputs).
    xr = x.astype(jnp.bfloat16).astype(jnp.float32)
    wr = w.astype(jnp.bfloat16).astype(jnp.float32)
    ref = jax.nn.softmax(xr @ wr + b, axis=-1)

    assert out.shape == (batch, output_size)
    assert out.dtype == x.dtype
    assert jnp.allclose(out, ref, atol=2e-3, rtol=2e-3), "mismatch vs reference"
    # rows of the softmax output must sum to 1 (exact division in the kernel)
    assert jnp.allclose(jnp.sum(out, axis=-1), jnp.ones((batch,)), atol=1e-3)

    print("KERNEL_OK")
</pallas_src>

<mosaic_0001>
module attributes {stable_mosaic.version = 11 : i64} {
  func.func @_gate_kernel(%arg0: i32, %arg1: memref<8x32xbf16, #tpu.memory_space<vmem>>, %arg2: memref<32x128xbf16, #tpu.memory_space<vmem>>, %arg3: memref<1x128xf32, #tpu.memory_space<vmem>>, %arg4: memref<8x128xf32, #tpu.memory_space<vmem>>) attributes {dimension_semantics = [#tpu.dimension_semantics<parallel>], iteration_bounds = array<i64: 1>, scalar_prefetch = 0 : i64, scratch_operands = 0 : i64, tpu.core_type = #tpu.core_type<tc>, window_params = [{transform_indices = @transform_0, window_bounds = array<i64: 8, 32>}, {pipeline_mode = #tpu.pipeline_mode<synchronous>, transform_indices = @transform_1, window_bounds = array<i64: 32, 128>}, {pipeline_mode = #tpu.pipeline_mode<synchronous>, transform_indices = @transform_2, window_bounds = array<i64: 1, 128>}, {transform_indices = @transform_3, window_bounds = array<i64: 8, 128>}]} {
    %c0 = arith.constant 0 : index
    %c0_0 = arith.constant 0 : index
    %0 = vector.load %arg1[%c0, %c0_0] : memref<8x32xbf16, #tpu.memory_space<vmem>>, vector<8x32xbf16>
    %c0_1 = arith.constant 0 : index
    %c0_2 = arith.constant 0 : index
    %1 = vector.load %arg2[%c0_1, %c0_2] : memref<32x128xbf16, #tpu.memory_space<vmem>>, vector<32x128xbf16>
    %cst = arith.constant dense<0.000000e+00> : vector<8x128xf32>
    %2 = tpu.matmul %0, %1, %cst {dimension_numbers = #tpu.dot_dimension_numbers<[1], [0], [0], [1], [0, 0, 1, 1], [], []>} : vector<8x32xbf16>, vector<32x128xbf16>, vector<8x128xf32> -> vector<8x128xf32>
    %c0_3 = arith.constant 0 : index
    %c0_4 = arith.constant 0 : index
    %3 = vector.load %arg3[%c0_3, %c0_4] : memref<1x128xf32, #tpu.memory_space<vmem>>, vector<1x128xf32>
    %4 = vector.broadcast %3 : vector<1x128xf32> to vector<8x128xf32>
    %5 = arith.addf %2, %4 : vector<8x128xf32>
    %cst_5 = arith.constant dense<0xFF800000> : vector<8xf32>
    %6 = vector.multi_reduction <maximumf>, %5, %cst_5 [1] : vector<8x128xf32> to vector<8xf32>
    %7 = vector.shape_cast %6 : vector<8xf32> to vector<8x1xf32>
    %8 = vector.broadcast %7 : vector<8x1xf32> to vector<8x128xf32>
    %9 = arith.subf %5, %8 : vector<8x128xf32>
    %10 = math.exp %9 : vector<8x128xf32>
    %cst_6 = arith.constant dense<0.000000e+00> : vector<8xf32>
    %11 = vector.multi_reduction <add>, %10, %cst_6 [1] : vector<8x128xf32> to vector<8xf32>
    %12 = vector.shape_cast %11 : vector<8xf32> to vector<8x1xf32>
    %13 = vector.broadcast %12 : vector<8x1xf32> to vector<8x128xf32>
    %14 = arith.divf %10, %13 : vector<8x128xf32>
    %c0_7 = arith.constant 0 : index
    %c0_8 = arith.constant 0 : index
    %15 = vector.load %arg4[%c0_7, %c0_8] : memref<8x128xf32, #tpu.memory_space<vmem>>, vector<8x128xf32>
    tpu.vector_store %arg4[%c0_7, %c0_8], %14 {strides = array<i32>} : memref<8x128xf32, #tpu.memory_space<vmem>>, vector<8x128xf32>,
    return
  }
  func.func @transform_0(%arg0: i32) -> (i32, i32) {
    %c0_i32 = arith.constant 0 : i32
    %c0_i32_0 = arith.constant 0 : i32
    return %arg0, %c0_i32 : i32, i32
  }
  func.func @transform_1(%arg0: i32) -> (i32, i32) {
    %c0_i32 = arith.constant 0 : i32
    %c0_i32_0 = arith.constant 0 : i32
    %c0_i32_1 = arith.constant 0 : i32
    return %c0_i32, %c0_i32_0 : i32, i32
  }
  func.func @transform_2(%arg0: i32) -> (i32, i32) {
    %c0_i32 = arith.constant 0 : i32
    %c0_i32_0 = arith.constant 0 : i32
    %c0_i32_1 = arith.constant 0 : i32
    return %c0_i32, %c0_i32_0 : i32, i32
  }
  func.func @transform_3(%arg0: i32) -> (i32, i32) {
    %c0_i32 = arith.constant 0 : i32
    %c0_i32_0 = arith.constant 0 : i32
    return %arg0, %c0_i32 : i32, i32
  }
}

</mosaic_0001>

<bundles_post_ra>
// kernel: tpu_custom_call.1
= control target key start
LH: loop header
LB: loop body
LE: loop exit
PB: predicated region body
PF: predicated region fallthrough
CT: control target
= control target key end

     0   :  { %8 = vsyncpa [#allocation3], 0  ;;  %s309_s0 = inlined_call_operand.hbm [shape: bf16[8,32], index: 0, kind: input, shape index: {}]   ;;  %s310_s1 = inlined_call_operand.hbm [shape: bf16[32,128], index: 1, kind: input, shape index: {}]   ;;  %s311_s2 = inlined_call_operand.vmem [shape: f32[1,128], index: 2, kind: input, shape index: {}]   ;;  %s312_s3 = inlined_call_operand.hbm [shape: f32[8,128], index: 3, kind: output, shape index: {}]  }
   0x1   :  { %9 = vsyncpa [#allocation6], 0 }
   0x2   :  { %10 = vsyncpa [#allocation4], 0  ;;  %s236_s12 = smov [#allocation2]   ;;  %s237_s14 = smov [#allocation5]  }
   0x3   :  { %s17_s13 = sshll.u32 %s236_s12, 4  ;;  %s26_s15 = sshll.u32 %s237_s14, 4  ;;  %s18_s13 = int_to_ptr.vmem [resolvable:$true] %s17_s13  ;;  %s263_s15 = int_to_ptr.vmem [resolvable:$true] %s26_s15 }
   0x4   :  { %s164_s18 = scalar_lea.hbm %s309_s0, 64 }
   0x5   :  { %p165_p0 = scmp.ne.s32.totalorder %s309_s0, %s164_s18  ;;  %p168_p1 = scmp.lt.u32.totalorder %s164_s18, %s309_s0 }
   0x7   :  { %p170_p2 = pnand %p168_p1, %p165_p0 }
   0x9   :  { %173 = shalt.err (!%p170_p2)
}
   0xa   :  { %s174_s23 = scalar_lea.vmem %s18_s13, 64  ;;  %p179_p4 = scmp.lt.s32.totalorder %s18_s13, %s18_s13 }
   0xb   :  { %p175_p3 = scmp.ne.s32.totalorder %s18_s13, %s174_s23  ;;  %p180_p5 = scmp.lt.s32.totalorder %s174_s23, %s174_s23 }
   0xd   :  { %p181_p6 = por %p180_p5, %p179_p4 }
   0xf   :  { %p182_p7 = pnand %p181_p6, %p175_p3 }
  0x11   :  { %185 = shalt.err (!%p182_p7)
}
  0x12   :  { %20 = dma.hbm_to_vmem [thread:$0]  %s309_s0, 64, %s18_s13, [#allocation3]  }
  0x13   :  { %s186_s28 = scalar_lea.hbm %s310_s1, 256 }
  0x14   :  { %p187_p8 = scmp.ne.s32.totalorder %s310_s1, %s186_s28  ;;  %p190_p9 = scmp.lt.u32.totalorder %s186_s28, %s310_s1 }
  0x16   :  { %p192_p10 = pnand %p190_p9, %p187_p8 }
  0x18   :  { %195 = shalt.err (!%p192_p10)
}
  0x19   :  { %s196_s6 = scalar_lea.vmem %s263_s15, 256  ;;  %p201_p12 = scmp.lt.s32.totalorder %s263_s15, %s263_s15 }
  0x1a   :  { %p197_p11 = scmp.ne.s32.totalorder %s263_s15, %s196_s6  ;;  %p202_p13 = scmp.lt.s32.totalorder %s196_s6, %s196_s6 }
  0x1c   :  { %p203_p0 = por %p202_p13, %p201_p12 }
  0x1e   :  { %p204_p1 = pnand %p203_p0, %p197_p11 }
  0x20   :  { %207 = shalt.err (!%p204_p1)
}
  0x21   :  { %s238_s0 = smov 64   ;;  %s239_s7 = smov 4  }
  0x22   :  { %32 = dma.hbm_to_vmem [thread:$0]  %s310_s1, 256, %s263_s15, [#allocation6], %s238_s0, %s238_s0, %s239_s7  }
  0x23   :  { %230 = dma.done.wait [#allocation3], 64  }
  0x24   :  { %231 = vsyncadd [#allocation3], 4294967232 }
  0x25   :  { %232 = dma.done.wait [#allocation6], 256  }
  0x26   :  { %233 = vsyncadd [#allocation6], 4294967040  ;;  %v240_v0 = vmov 0.0   ;;  %vm241_vm0 = vmmov 0   ;;  %v158_v1 = vld [vmem:[#allocation5] sm:$0xff]   ;;  %v159_v2 = vld [vmem:[#allocation5 + $0x8] sm:$0xff]  }
  0x27   :  { %143 = vmatprep.subr.bf16.mxu0 %v240_v0  ;;  %147 = vmatprep.mubr.msk.bf16.mxu0 %vm241_vm0, %v240_v0  ;;  %v42_v3 = vld [vmem:[#allocation2] sm:$0xf]  ;;  %vm66_vm1 = vcmask 261120   ;;  %s242_s1 = smov [#allocation7]  }
  0x28   :  { %144 = vmatpush3.bf16.msra.mxu0 %v158_v1  ;;  %v136_v4 = vld [vmem:[%s311_s2] ss:$0 sm:$0xff]  ;;  %s126_s12 = sshll.u32 %s242_s1, 4  ;;  %s127_s12 = int_to_ptr.vmem [resolvable:$true] %s126_s12 }
  0x29   :  { %145 = vmatprep.subr.bf16.mxu0 %v240_v0  ;;  %s208_s2 = scalar_lea.vmem %s127_s12, 128  ;;  %p213_p3 = scmp.lt.s32.totalorder %s127_s12, %s127_s12 }
  0x2a   :  { %p209_p2 = scmp.ne.s32.totalorder %s127_s12, %s208_s2  ;;  %p214_p4 = scmp.lt.s32.totalorder %s208_s2, %s208_s2 }
  0x2c   :  { %146 = vmatpush3.bf16.msra.mxu0 %v159_v2  ;;  %p215_p5 = por %p214_p4, %p213_p3 }
  0x2e   :  { %p216_p6 = pnand %p215_p5, %p209_p2 }
  0x2f   :  { %148 = vmatmul.mubr.msk.bf16.vlgmr.msra.gmra.mrb[0].mxu0 %vm66_vm1, %v42_v3 }
 0x102   :  { %v104_v5 = vpop.f32.mrb[0].mxu0 }
 0x103   :  { %v105_v6 = vadd.f32 %v136_v4, %v104_v5  ;;  %v149_v7 = vpop.f32.mrb[1].mxu0 }
 0x104   :  { %v107_v8 = vpop.f32.mrb[2].mxu0 }
 0x105   :  { %110 = vmax.xlane.f32.xlu0 %v105_v6  ;;  %v150_v9 = vpop.f32.mrb[3].mxu0 }
 0x192   :  { %v111_v10 = vpop.xlane.xlu0 %110 }
 0x193   :  { %v112_v11 = vsub.f32 %v105_v6, %v111_v10 }
 0x195   :  { %v113_v12 = vmul.f32 1.442695, %v112_v11 }
 0x197   :  { %160 = vpow2.f32 %v113_v12 }
 0x1a1   :  { %v161_v13 = vpop.eup %160 }
 0x1a2   :  { %115 = vadd.xlane.f32.xlu0 %v161_v13 }
 0x22f   :  { %v116_v14 = vpop.xlane.xlu0 %115 }
 0x230   :  { %162 = vrcp.f32 %v116_v14 }
 0x23a   :  { %v163_v15 = vpop.eup %162 }
 0x23b   :  { %v118_v16 = vmul.f32 %v163_v15, %v161_v13 }
 0x23d   :  { %119 = vst [vmem:[#allocation7] sm:$0xff] %v118_v16 }
 0x23e   :  { %219 = shalt.err (!%p216_p6)
}
 0x23f   :  { %s220_s15 = scalar_lea.hbm %s312_s3, 128 }
 0x240   :  { %p221_p7 = scmp.ne.s32.totalorder %s312_s3, %s220_s15  ;;  %p224_p8 = scmp.lt.u32.totalorder %s220_s15, %s312_s3 }
 0x242   :  { %p226_p9 = pnand %p224_p8, %p221_p7 }
 0x244   :  { %229 = shalt.err (!%p226_p9)
}
 0x245   :  { %129 = dma.vmem_to_hbm [thread:$0]  %s127_s12, 128, %s312_s3, [#allocation4]  }
 0x246   :  { %234 = dma.done.wait [#allocation4], 128  }
 0x247   :  { %235 = vsyncadd [#allocation4], 4294967168 }
 0x248   :  { %133 = vsyncpa [#allocation3], 1 }
 0x249   :  { %134 = vsyncpa [#allocation6], 1 }
 0x24a   :  { %135 = vsyncpa [#allocation4], 1 }

</bundles_post_ra>
